<compile_context>
chip_gen: v6e
topology: v6e:2x2x1
jax: 0.10.0
libtpu: 0.0.40
codegen_flags: <defaults>
</compile_context>

<pallas_src>
import functools

import jax
import jax.numpy as jnp
from jax.experimental import pallas as pl
from jax.experimental.pallas import tpu as pltpu


# ---------------------------------------------------------------------------
# Kernels
# ---------------------------------------------------------------------------

def _softmax_dim0_fused_kernel(x_ref, o_ref, *, compute_dtype):
    """Softmax over axis 0; the whole reduction axis is resident in this block."""
    x = x_ref[...].astype(compute_dtype)
    x_max = jnp.max(x, axis=0, keepdims=True)          # torch.max(x, dim=0, keepdim=True)
    x_exp = jnp.exp(x - x_max)
    # Per-column exact reciprocal + broadcast multiply instead of N*tile_d divides.
    denom = jnp.sum(x_exp.astype(jnp.float32), axis=0, keepdims=True)
    inv = (1.0 / denom).astype(compute_dtype)
    o_ref[...] = (x_exp * inv).astype(o_ref.dtype)


def _softmax_dim0_stats_kernel(x_ref, max_ref, sum_ref, *, n_rows, tile_n):
    """Pass 1 of the large-N fallback: online per-column max & sum over row tiles.

    The output BlockSpecs ignore the reduction index k, so max_ref/sum_ref stay
    resident in VMEM across the whole k axis and are used directly as
    accumulators (no scratch buffers, no final copy).
    """
    k = pl.program_id(1)

    @pl.when(k == 0)
    def _():
        max_ref[...] = jnp.full_like(max_ref, -jnp.inf)
        sum_ref[...] = jnp.zeros_like(sum_ref)

    x = x_ref[...].astype(jnp.float32)
    if n_rows % tile_n != 0:                 # static: only mask when rows are ragged
        row = k * tile_n + jax.lax.broadcasted_iota(jnp.int32, x.shape, 0)
        x = jnp.where(row < n_rows, x, -jnp.inf)

    m_old = max_ref[...]
    m_new = jnp.maximum(m_old, jnp.max(x, axis=0, keepdims=True))
    # NOTE: a column that is entirely -inf yields NaN here (-inf - -inf), which
    # matches the reference / torch behaviour (0/0 -> NaN); no fix required.
    sum_ref[...] = (sum_ref[...] * jnp.exp(m_old - m_new)
                    + jnp.sum(jnp.exp(x - m_new), axis=0, keepdims=True))
    max_ref[...] = m_new


def _softmax_dim0_normalize_kernel(x_ref, max_ref, sum_ref, o_ref):
    """Pass 2 of the large-N fallback: elementwise exp + per-column scale."""
    x = x_ref[...].astype(jnp.float32)
    inv = 1.0 / sum_ref[...]
    o_ref[...] = (jnp.exp(x - max_ref[...]) * inv).astype(o_ref.dtype)


# ---------------------------------------------------------------------------
# Tile-size / VMEM helpers
# ---------------------------------------------------------------------------

def _round_up(a, b):
    return -(-a // b) * b


def _vmem_capacity_bytes():
    """Per-core VMEM capacity; generation-aware fallback when the query fails."""
    try:
        info = pltpu.get_tpu_info()
        cap = getattr(info, "vmem_capacity_bytes", None)
        if cap:
            return int(cap)
    except Exception:
        pass
    try:
        kind = jax.devices()[0].device_kind.lower()
        if "v7" in kind:
            return 64 * 1024 * 1024          # v7x: 64 MiB per TensorCore
        return 128 * 1024 * 1024             # v5e / v6e: 128 MiB
    except Exception:
        return 64 * 1024 * 1024              # conservative default


def _pick_fused_tile_d(D, per_col_bytes, in_col_bytes, vmem_budget,
                       *, min_steps=8, target_block_bytes=2 << 20):
    """Lane-dense (multiple-of-128) tile width that fits the VMEM budget,
    targets ~2 MiB input blocks, and keeps >= min_steps grid steps when D allows."""
    if D <= 128:
        return D
    cols_vmem = vmem_budget // max(1, per_col_bytes)
    cols_target = max(128, target_block_bytes // max(1, in_col_bytes))
    cols_steps = max(128, _round_up(pl.cdiv(D, min_steps), 128))
    tile_d = min(cols_vmem, cols_target, cols_steps, D)
    return max(128, (tile_d // 128) * 128)


def _pick_tile_n(N, tile_d, itemsize, vmem_budget, *, buffered_cols, f32_tmp_cols,
                 target_block_bytes=4 << 20, max_rows=2048):
    """Row-tile height (multiple of 8) for the two-pass fallback."""
    n_cap = _round_up(N, 8)
    row_bytes = tile_d * (buffered_cols * itemsize + f32_tmp_cols * 4)
    rows_vmem = vmem_budget // max(1, row_bytes)
    rows_target = target_block_bytes // max(1, tile_d * itemsize)
    rows = min(rows_vmem, rows_target, n_cap, max_rows)
    return max(8, (rows // 8) * 8)


# ---------------------------------------------------------------------------
# Wrapper
# ---------------------------------------------------------------------------

def softmax_stable(x, *, tile_d=None, tile_n=None, force_two_pass=False):
    """Numerically-stable softmax over axis 0 (torch dim=0) for any-rank input."""
    orig_shape = x.shape
    N = orig_shape[0]
    x2 = x.reshape(N, -1)
    D = x2.shape[1]
    itemsize = jnp.dtype(x2.dtype).itemsize

    # For bf16 inputs compute exp in bf16 (bf16 VPU/EUP on v6e/v7x; matches the
    # input dtype semantics) so live full-block intermediates are halved.
    # Column sums always accumulate in f32.  v5e simply promotes internally.
    compute_dtype = jnp.bfloat16 if x2.dtype == jnp.bfloat16 else jnp.float32
    acc_itemsize = jnp.dtype(compute_dtype).itemsize

    vmem_cap = _vmem_capacity_bytes()
    vmem_budget = int(vmem_cap * 0.65)       # headroom for compiler temporaries

    def _cparams(sem):
        return pltpu.CompilerParams(dimension_semantics=sem,
                                    vmem_limit_bytes=vmem_budget)

    n_est = _round_up(N, 8)                  # layout-padding estimate only (no jnp.pad)
    # Per-column VMEM footprint of one fused grid step:
    #   double-buffered input + double-buffered output + compute-dtype temps.
    per_col_fused = 4 * n_est * itemsize + 3 * n_est * acc_itemsize
    fused_fits = per_col_fused * min(D, 128) <= vmem_budget

    if fused_fits and not force_two_pass:
        # ---- fast path: full reduction axis resident per block ---------------
        # Block rows == full N (the (8,128) rule allows a block dim equal to the
        # full array dim), so no wrapper-side pad/slice HBM copies are needed.
        if tile_d is None:
            tile_d = _pick_fused_tile_d(D, per_col_fused, n_est * itemsize,
                                        vmem_budget)
        tile_d = min(tile_d, D)
        grid = (pl.cdiv(D, tile_d),)         # ragged last block is masked by Pallas

        kernel = functools.partial(_softmax_dim0_fused_kernel,
                                   compute_dtype=compute_dtype)
        out = pl.pallas_call(
            kernel,
            out_shape=jax.ShapeDtypeStruct((N, D), x2.dtype),
            grid_spec=pltpu.PrefetchScalarGridSpec(
                num_scalar_prefetch=0,
                grid=grid,
                in_specs=[pl.BlockSpec((N, tile_d), lambda j: (0, j))],
                out_specs=pl.BlockSpec((N, tile_d), lambda j: (0, j)),
            ),
            compiler_params=_cparams(("parallel",)),
            cost_estimate=pl.CostEstimate(
                flops=4 * N * D,
                transcendentals=N * D,
                bytes_accessed=2 * N * D * itemsize,
            ),
        )(x2)
        return out.reshape(orig_shape)

    # ---- large-N fallback: two passes, rows tiled, reduction axis last ------
    if tile_d is None:
        tile_d = min(D, 512)
        if D > 128:
            tile_d = max(128, (tile_d // 128) * 128)
    tile_d = min(tile_d, D)

    if tile_n is not None:
        tile_n_stats = tile_n_norm = _round_up(min(tile_n, _round_up(N, 8)), 8)
    else:
        # Pass 1 keeps only tiny per-column stats resident; pass 2 streams
        # input+output, so each picks its own largest block that fits.
        tile_n_stats = _pick_tile_n(N, tile_d, itemsize, vmem_budget,
                                    buffered_cols=2, f32_tmp_cols=2)
        tile_n_norm = _pick_tile_n(N, tile_d, itemsize, vmem_budget,
                                   buffered_cols=4, f32_tmp_cols=2)

    col_spec = pl.BlockSpec((1, tile_d), lambda j, k: (0, j))

    stats_kernel = functools.partial(_softmax_dim0_stats_kernel,
                                     n_rows=N, tile_n=tile_n_stats)
    col_max, col_sum = pl.pallas_call(
        stats_kernel,
        out_shape=(jax.ShapeDtypeStruct((1, D), jnp.float32),
                   jax.ShapeDtypeStruct((1, D), jnp.float32)),
        grid_spec=pltpu.PrefetchScalarGridSpec(
            num_scalar_prefetch=0,
            grid=(pl.cdiv(D, tile_d), pl.cdiv(N, tile_n_stats)),
            in_specs=[pl.BlockSpec((tile_n_stats, tile_d), lambda j, k: (k, j))],
            out_specs=[col_spec, col_spec],
        ),
        compiler_params=_cparams(("parallel", "arbitrary")),
        cost_estimate=pl.CostEstimate(
            flops=4 * N * D,
            transcendentals=2 * N * D,
            bytes_accessed=N * D * itemsize,
        ),
    )(x2)

    x_spec_norm = pl.BlockSpec((tile_n_norm, tile_d), lambda j, k: (k, j))
    out = pl.pallas_call(
        _softmax_dim0_normalize_kernel,
        out_shape=jax.ShapeDtypeStruct((N, D), x2.dtype),
        grid_spec=pltpu.PrefetchScalarGridSpec(
            num_scalar_prefetch=0,
            grid=(pl.cdiv(D, tile_d), pl.cdiv(N, tile_n_norm)),
            in_specs=[x_spec_norm, col_spec, col_spec],
            out_specs=x_spec_norm,
        ),
        compiler_params=_cparams(("parallel", "parallel")),
        cost_estimate=pl.CostEstimate(
            flops=3 * N * D,
            transcendentals=N * D,
            bytes_accessed=2 * N * D * itemsize,
        ),
    )(x2, col_max, col_sum)
    return out.reshape(orig_shape)


# ---------------------------------------------------------------------------
# Reference + test
# ---------------------------------------------------------------------------

def softmax_stable_ref(x):
    xf = x.astype(jnp.float32)
    x_max = jnp.max(xf, axis=0, keepdims=True)
    x_exp = jnp.exp(xf - x_max)
    return (x_exp / jnp.sum(x_exp, axis=0, keepdims=True)).astype(x.dtype)


if __name__ == "__main__":
    key = jax.random.PRNGKey(0)
    k1, k2, k3 = jax.random.split(key, 3)

    # Small shape consistent with the module's forward: [N, D], softmax over N.
    x = jax.random.normal(k1, (8, 256), dtype=jnp.float32) * 3.0
    out = jax.block_until_ready(softmax_stable(x))
    ref = softmax_stable_ref(x)
    assert out.shape == x.shape and out.dtype == x.dtype
    assert jnp.allclose(out, ref, atol=1e-6, rtol=1e-6), "fused path mismatch"
    assert jnp.allclose(jnp.sum(out, axis=0), jnp.ones((256,)), atol=1e-5)

    # Structurally exercise the large-N two-pass fallback at a small shape
    # (N not a multiple of the row tile -> masking path is covered too).
    x_big = jax.random.normal(k2, (70, 256), dtype=jnp.float32) * 3.0
    out_big = jax.block_until_ready(
        softmax_stable(x_big, force_two_pass=True, tile_n=32))
    ref_big = softmax_stable_ref(x_big)
    assert out_big.shape == x_big.shape and out_big.dtype == x_big.dtype
    assert jnp.allclose(out_big, ref_big, atol=1e-5, rtol=1e-5), "two-pass mismatch"
    assert jnp.allclose(jnp.sum(out_big, axis=0), jnp.ones((256,)), atol=1e-4)

    # Higher-rank input: torch softmax(dim=0) over a 3-D tensor.
    x3 = jax.random.normal(k3, (8, 4, 32), dtype=jnp.float32) * 2.0
    out3 = jax.block_until_ready(softmax_stable(x3))
    ref3 = softmax_stable_ref(x3)
    assert out3.shape == x3.shape
    assert jnp.allclose(out3, ref3, atol=1e-6, rtol=1e-6), "3-D path mismatch"

    print("KERNEL_OK")
</pallas_src>

<mosaic_0001>
module attributes {stable_mosaic.version = 11 : i64} {
  func.func @_softmax_dim0_fused_kernel(%arg0: i32, %arg1: memref<8x128xf32, #tpu.memory_space<vmem>>, %arg2: memref<8x128xf32, #tpu.memory_space<vmem>>) attributes {dimension_semantics = [#tpu.dimension_semantics<parallel>], iteration_bounds = array<i64: 2>, scalar_prefetch = 0 : i64, scratch_operands = 0 : i64, tpu.core_type = #tpu.core_type<tc>, window_params = [{transform_indices = @transform_0, window_bounds = array<i64: 8, 128>}, {transform_indices = @transform_1, window_bounds = array<i64: 8, 128>}]} {
    %c0 = arith.constant 0 : index
    %c0_0 = arith.constant 0 : index
    %0 = vector.load %arg1[%c0, %c0_0] : memref<8x128xf32, #tpu.memory_space<vmem>>, vector<8x128xf32>
    %cst = arith.constant dense<0xFF800000> : vector<128xf32>
    %1 = vector.multi_reduction <maximumf>, %0, %cst [0] : vector<8x128xf32> to vector<128xf32>
    %2 = vector.shape_cast %1 : vector<128xf32> to vector<1x128xf32>
    %3 = vector.broadcast %2 : vector<1x128xf32> to vector<8x128xf32>
    %4 = arith.subf %0, %3 : vector<8x128xf32>
    %5 = math.exp %4 : vector<8x128xf32>
    %cst_1 = arith.constant dense<0.000000e+00> : vector<128xf32>
    %6 = vector.multi_reduction <add>, %5, %cst_1 [0] : vector<8x128xf32> to vector<128xf32>
    %7 = vector.shape_cast %6 : vector<128xf32> to vector<1x128xf32>
    %cst_2 = arith.constant 1.000000e+00 : f32
    %8 = vector.broadcast %cst_2 : f32 to vector<1x128xf32>
    %9 = arith.divf %8, %7 : vector<1x128xf32>
    %10 = vector.broadcast %9 : vector<1x128xf32> to vector<8x128xf32>
    %11 = arith.mulf %5, %10 : vector<8x128xf32>
    %c0_3 = arith.constant 0 : index
    %c0_4 = arith.constant 0 : index
    %12 = vector.load %arg2[%c0_3, %c0_4] : memref<8x128xf32, #tpu.memory_space<vmem>>, vector<8x128xf32>
    tpu.vector_store %arg2[%c0_3, %c0_4], %11 {strides = array<i32>} : memref<8x128xf32, #tpu.memory_space<vmem>>, vector<8x128xf32>,
    return
  }
  func.func @transform_0(%arg0: i32) -> (i32, i32) {
    %c0_i32 = arith.constant 0 : i32
    %c0_i32_0 = arith.constant 0 : i32
    return %c0_i32, %arg0 : i32, i32
  }
  func.func @transform_1(%arg0: i32) -> (i32, i32) {
    %c0_i32 = arith.constant 0 : i32
    %c0_i32_0 = arith.constant 0 : i32
    return %c0_i32, %arg0 : i32, i32
  }
}

</mosaic_0001>

<bundles_post_ra>
// kernel: tpu_custom_call.1
= control target key start
LH: loop header
LB: loop body
LE: loop exit
PB: predicated region body
PF: predicated region fallthrough
CT: control target
= control target key end

     0   :  { %6 = vsyncpa [#allocation3], 0  ;;  %s545_s0 = inlined_call_operand.hbm [shape: f32[8,256], index: 0, kind: input, shape index: {}]   ;;  %s546_s1 = inlined_call_operand.hbm [shape: f32[8,256], index: 1, kind: output, shape index: {}]  }
   0x1   :  { %8 = vsyncpa [#allocation3 + $0x1], 0 }
   0x2   :  { %9 = vsyncpa [#allocation4], 0 }
   0x3   :  { %11 = vsyncpa [#allocation4 + $0x1], 0  ;;  %s404_s6 = smov 0   ;;  %s406_s7 = smov 0  }
   0x4   :  { %s408_s8 = smov 0   ;;  %s410_s9 = smov 0  }
   0x5 LB: > { %s425_s10 = sadd.s32 4294967295, %s390_s9   ;;  %s236_s11 = sadd.s32 4294967294, %s390_s9   ;;  %s390_s9 = sphi %s410_s9, %s563_s9   ;;  %s386_s8 = sphi %s408_s8, %s562_s8   ;;  %s382_s7 = sphi %s406_s7, %s561_s7   ;;  %s378_s6 = sphi %s404_s6, %s560_s6  }
   0x6   : > { %s429_s12 = sadd.s32 1, %s390_s9   ;;  %s24_s13 = sadd.s32 1, %s386_s8 }
   0x7   : > { %s21_s14 = ssub.s32 %s390_s9, %s429_s12  ;;  %p31_p0 = scmp.ne.s32.totalorder %s386_s8, %s382_s7 }
   0x8   : > { %p22_p1 = scmp.eq.s32.totalorder %s21_s14, 0  ;;  %p32_p2 = scmp.eq.s32.totalorder %s390_s9, 0 }
   0x9   : > { %p37_p3 = scmp.ne.s32.totalorder %s382_s7, %s378_s6  ;;  %p38_p4 = scmp.eq.s32.totalorder %s425_s10, 0 }
   0xa   : > { %s441_s15 = scalar_select %p22_p1, %s386_s8, %s24_s13  }
   0xb   : > { %p443_p5 = por %p32_p2, %p31_p0  ;;  %p447_p6 = por %p38_p4, %p37_p3 }
   0xc   : > { %p61_p7 = scmp.eq.s32.totalorder %s425_s10, 1  ;;  %p67_p8 = scmp.eq.s32.totalorder %s236_s11, 1 }
   0xd   : > { %s550_s17 = scalar_select %p447_p6, 1, 0 }
   0xe   : > { %p260_p10 = scmp.lt.s32.totalorder %s390_s9, 2  ;;  %p454_p11 = por %p61_p7, %p31_p0 }
   0xf   : > { %p458_p12 = por %p67_p8, %p37_p3  ;;  %s87_s20 = sand.u32 1, %s386_s8  }
  0x10   : > { %s551_s18 = scalar_select %p454_p11, 1, 0 }
  0x11   : > { %s552_s19 = scalar_select %p458_p12, 1, 0 }
  0x12   : > { %s240_s21 = sshll.u32 %s390_s9, 7  ;;  %s239_s22 = sshll.u32 %s87_s20, 3 }
  0x13   : > { %s467_s25 = scalar_lea.hbm %s545_s0, %s240_s21  ;;  %s91_s26 = scalar_lea.vmem [#allocation2], %s239_s22 }
  0x14   : > { %s98_s27 = sshll.u32 %s91_s26, 4  ;;  %p471_p13 = pnand %p260_p10, %p443_p5  ;;  %s475_s27 = int_to_ptr.vmem [resolvable:$true] %s98_s27 }
  0x15   : > { %s88_s29 = scalar_lea.sflag [#allocation3], %s87_s20  ;;  %s298_s30 = scalar_lea.hbm %s467_s25, 128 }
  0x16   : > { %p299_p2 = scmp.ne.s32.totalorder %s467_s25, %s298_s30  ;;  %p300_p3 = pneg %p471_p13 }
  0x17   : > { %s303_s4 = scalar_lea.hbm %s545_s0, 256  ;;  %p304_p5 = scmp.lt.s32.totalorder %s467_s25, %s545_s0 }
  0x18   : > { %p301_p4 = pnand %p300_p3, %p299_p2  ;;  %p305_p8 = scmp.lt.s32.totalorder %s303_s4, %s298_s30 }
  0x1a   : > { %p302_p7 = pneg %p301_p4  ;;  %p306_p10 = por %p305_p8, %p304_p5 }
  0x1c   : > { %p307_p9 = pnand %p306_p10, %p302_p7 }
  0x1e   : > { %310 = shalt.err (!%p307_p9)
}
  0x1f   : > { %s311_s13 = scalar_lea.vmem %s475_s27, 128  ;;  %s392_s14 = smov [#allocation2]  }
  0x20   : > { %p312_p0 = scmp.ne.s32.totalorder %s475_s27, %s311_s13  ;;  %s316_s16 = sshll.u32 %s392_s14, 4  ;;  %s317_s16 = int_to_ptr.vmem [resolvable:$false] %s316_s16 }
  0x21   : > { %s318_s20 = scalar_lea.vmem %s317_s16, 256  ;;  %p319_p4 = scmp.lt.s32.totalorder %s475_s27, %s317_s16 }
  0x22   : > { %p314_p1 = pnand %p312_p0, %p300_p3  ;;  %p320_p12 = scmp.lt.s32.totalorder %s318_s20, %s311_s13 }
  0x24   : > { %p315_p2 = pneg %p314_p1  ;;  %p321_p11 = por %p320_p12, %p319_p4 }
  0x26   : > { %p322_p6 = pnand %p321_p11, %p315_p2 }
  0x28   : > { %325 = shalt.err (!%p322_p6)
}
  0x29   : > { %255 = dma.hbm_to_vmem [thread:$0]  (!%p471_p13), %s467_s25, 128, %s475_s27, %s88_s29  }
  0x2a   : > { %p554_p9 = scmp.lt.s32.totalorder %s390_s9, 3  ;;  %p555_p7 = scmp.ge.s32.totalorder %s390_s9, 1 }
  0x2c   : > { %p104_p0 = pnand %p555_p7, %p554_p9 }
  0x2d   : > { %s502_s21 = sand.u32 (!%p104_p0), 1, %s382_s7   ;;  %p556_p6 = scmp.ne.s32.totalorder (!%p104_p0), %s550_s17, 0 }
  0x2e   : > { %107 = sbr.rel (%p104_p0) target bundleno = 124 (0x7c), region = 24  ;;  %s242_s22 = sshll.u32 (!%p104_p0), %s502_s21, 3 }
  0x2f   : > { %s110_s23 = scalar_lea.sflag (!%p104_p0), [#allocation3], %s502_s21  ;;  %s113_s24 = scalar_lea.vmem (!%p104_p0), [#allocation2], %s242_s22 }
  0x33   : > { %369 = dma.done.wait (%p556_p6), %s110_s23, 128  }
  0x34   : > { %371 = vsyncadd (%p556_p6), %s110_s23, 4294967168  ;;  %v132_v0 = vld [vmem:[%s113_s24] sm:$0xff]  ;;  %s131_s17 = scalar_lea.vmem [#allocation5], %s242_s22  ;;  %s245_s26 = sshll.u32 %s425_s10, 7 }
  0x35   : > { %v133_v1 = vrot.slane %v132_v0, 4  ;;  %s166_s25 = sshll.u32 %s131_s17, 4  ;;  %s164_s29 = scalar_lea.hbm %s546_s1, %s245_s26  ;;  %s167_s25 = int_to_ptr.vmem [resolvable:$true] %s166_s25 }
  0x36   : > { %s153_s30 = scalar_lea.sflag [#allocation4], %s502_s21  ;;  %s326_s2 = scalar_lea.vmem %s167_s25, 128 }
  0x37   : > { %v134_v2 = vmax.f32 %v132_v0, %v133_v1  ;;  %p327_p11 = scmp.ne.s32.totalorder %s167_s25, %s326_s2  ;;  %p557_p12 = scmp.ne.s32.totalorder %s551_s18, 0 }
  0x38   : > { %s393_s3 = smov [#allocation5]  }
  0x39   : > { %v135_v3 = vrot.slane %v134_v2, 2  ;;  %p328_p13 = pnand %p327_p11, %p557_p12  ;;  %s330_s4 = sshll.u32 %s393_s3, 4  ;;  %s331_s4 = int_to_ptr.vmem [resolvable:$false] %s330_s4 }
  0x3a   : > { %s332_s5 = scalar_lea.vmem %s331_s4, 256  ;;  %p333_p3 = scmp.lt.s32.totalorder %s167_s25, %s331_s4 }
  0x3b   : > { %v136_v4 = vmax.f32 %v134_v2, %v135_v3  ;;  %p329_p1 = pneg %p328_p13  ;;  %p334_p5 = scmp.lt.s32.totalorder %s332_s5, %s326_s2 }
  0x3d   : > { %v137_v5 = vrot.slane %v136_v4, 1  ;;  %p335_p8 = por %p334_p5, %p333_p3 }
  0x3f   : > { %v138_v6 = vmax.f32 %v136_v4, %v137_v5  ;;  %p336_p10 = pnand %p335_p8, %p329_p1 }
  0x41   : > { %v139_v7 = vsub.f32 %v132_v0, %v138_v6 }
  0x43   : > { %v140_v8 = vmul.f32 1.442695, %v139_v7 }
  0x45   : > { %294 = vpow2.f32 %v140_v8 }
  0x52   : > { %v295_v9 = vpop.eup %294 }
  0x53   : > { %v142_v10 = vrot.slane %v295_v9, 4 }
  0x55   : > { %v143_v11 = vadd.f32 %v295_v9, %v142_v10 }
  0x57   : > { %v144_v12 = vrot.slane %v143_v11, 2 }
  0x59   : > { %v145_v13 = vadd.f32 %v144_v12, %v143_v11 }
  0x5b   : > { %v146_v14 = vrot.slane %v145_v13, 1 }
  0x5d   : > { %v147_v15 = vadd.f32 %v146_v14, %v145_v13 }
  0x5f   : > { %296 = vrcp.f32 %v147_v15 }
  0x6c   : > { %v297_v16 = vpop.eup %296 }
  0x6d   : > { %v150_v17 = vmul.f32 %v297_v16, %v295_v9 }
  0x6f   : > { %151 = vst [vmem:[%s131_s17] sm:$0xff] %v150_v17 }
  0x70   : > { %339 = shalt.err (!%p336_p10)
}
  0x71   : > { %s340_s10 = scalar_lea.hbm %s164_s29, 128  ;;  %s344_s14 = scalar_lea.hbm %s546_s1, 256 }
  0x72   : > { %p341_p2 = scmp.ne.s32.totalorder %s164_s29, %s340_s10  ;;  %p345_p7 = scmp.lt.s32.totalorder %s164_s29, %s546_s1 }
  0x73   : > { %p346_p0 = scmp.lt.s32.totalorder %s344_s14, %s340_s10 }
  0x74   : > { %p342_p4 = pnand %p341_p2, %p557_p12 }
  0x75   : > { %p347_p6 = por %p346_p0, %p345_p7 }
  0x76   : > { %p343_p9 = pneg %p342_p4 }
  0x78   : > { %p348_p11 = pnand %p347_p6, %p343_p9 }
  0x7a   : > { %351 = shalt.err (!%p348_p11)
}
  0x7b   : > { %250 = dma.vmem_to_hbm [thread:$0]  (%p557_p12), %s167_s25, 128, %s164_s29, %s153_s30  }
  0x7c PF: > { %s178_s21 = sand.u32 1, %s378_s6   ;;  %p558_p13 = scmp.ne.s32.totalorder %s552_s19, 0 }
  0x7d   : > { %p559_p1 = scmp.ge.s32.totalorder %s390_s9, 2  ;;  %s179_s22 = scalar_lea.sflag [#allocation4], %s178_s21 }
  0x7f   : > { %p257_p3 = pnand %p559_p1, %p558_p13 }
  0x81   : > { %p258_p5 = pneg %p257_p3 }
  0x83   : > { %373 = dma.done.wait (%p258_p5), %s179_s22, 128  }
  0x84   : > { %375 = vsyncadd (%p258_p5), %s179_s22, 4294967168  ;;  %p14_p8 = scmp.ge.s32.totalorder %s429_s12, 4   ;;  %s560_s6 = smov %s382_s7 }
  0x85   : > { %s561_s7 = smov %s386_s8  ;;  %s562_s8 = smov %s441_s15 }
  0x86   : > { %s563_s9 = smov %s429_s12  ;;  %16 = sbr.rel (!%p14_p8) target bundleno = 5 (0x5), region = 69 }
  0x8b   :  { %184 = vsyncpa [#allocation3], 1 }
  0x8c   :  { %186 = vsyncpa [#allocation3 + $0x1], 1 }
  0x8d   :  { %187 = vsyncpa [#allocation4], 1 }
  0x8e   :  { %189 = vsyncpa [#allocation4 + $0x1], 1 }

</bundles_post_ra>
